<compile_context>
chip_gen: v7x
topology: tpu7x:2x2x1
jax: 0.10.0
libtpu: 0.0.40
codegen_flags: <defaults>
</compile_context>

<pallas_src>
import jax
import jax.numpy as jnp
from jax import lax
from jax.experimental import pallas as pl
from jax.experimental.pallas import tpu as pltpu


def _sigmoid(x):
    # Exact identity sigmoid(x) == 0.5 * tanh(0.5 * x) + 0.5; a single EUP op
    # (tanh) + VPU fma instead of exp + divide.
    return 0.5 * jnp.tanh(0.5 * x) + 0.5


def _fc_kernel(x_ref, w1_ref, b1_ref, w2c_ref, b2_ref, o_ref):
    # x_ref:   [TILE_B, 10]  (native batch-major input block)
    # w1_ref:  [10, 10]      (PyTorch [out, in] layout)
    # b1_ref:  [10, 1]
    # w2c_ref: [10, 1]       (fc2 weight as a column)
    # b2_ref:  [1, 1]
    # o_ref:   [1, TILE_B]   (lane-dense output slab)
    x = x_ref[...]
    # h[f, b] = sum_k w1[f, k] * x[b, k]  -> [10, TILE_B]; the MXU handles the
    # transposed-RHS contraction, so batch lands on the lane axis with no
    # explicit relayout of the large operand.
    h = lax.dot_general(
        w1_ref[...], x,
        dimension_numbers=(((1,), (1,)), ((), ())),
        preferred_element_type=jnp.float32,
    )
    h = _sigmoid(h + b1_ref[...])                                    # [10, TB]
    # Layer 2: VPU multiply + cross-sublane reduce keeps the result [1, TILE_B]
    # and avoids a degenerate 1-row matmul / masked 1-lane stores.
    y = jnp.sum(w2c_ref[...] * h, axis=0, keepdims=True) + b2_ref[...]
    o_ref[...] = _sigmoid(y).astype(o_ref.dtype)                     # [1, TB]


def simple_fc_forward(x, w1, b1, w2, b2, *, tile_b=16384):
    """Forward pass of SimpleFCModel.

    x : [B, 10]  float32 (consumed in native layout, no transpose/pad copies)
    w1: [10, 10] PyTorch layout (out, in)
    b1: [10]
    w2: [1, 10]  PyTorch layout (out, in)
    b2: [1]
    returns [B, 1] float32
    """
    B, F = x.shape
    assert F == 10, f"expected 10 input features, got {F}"

    # Keep at least ~4 grid steps when B is large (megacore sharding on v7x +
    # prologue/epilogue overlap), but never below one 128-lane group.  tile_b
    # stays a multiple of 128 so the lane-dense output block divides cleanly.
    tile_b = max(128, min(tile_b, pl.cdiv(pl.cdiv(B, 4), 128) * 128))
    grid = (pl.cdiv(B, tile_b),)

    b1_col = b1.reshape(10, 1)              # [10, 1]
    w2_col = w2.reshape(1, 10).T            # [10, 1] (tiny, negligible)
    b2_col = b2.reshape(1, 1)               # [1, 1]

    # VMEM budget: the [tile_b, 10] f32 input block lane-pads 10 -> 128
    # (512 B/row); the [1, tile_b] output block sublane-pads 1 -> 8.  Both are
    # double-buffered by the pipeline.
    x_buf = tile_b * 128 * 4
    o_buf = 8 * tile_b * 4
    vmem_limit = int(min(max(2 * (x_buf + o_buf) + (4 << 20), 32 << 20), 48 << 20))

    out = pl.pallas_call(
        _fc_kernel,
        out_shape=jax.ShapeDtypeStruct((1, B), jnp.float32),
        grid=grid,
        in_specs=[
            pl.BlockSpec((tile_b, 10), lambda i: (i, 0)),   # x tile (pipelined)
            pl.BlockSpec((10, 10), lambda i: (0, 0)),       # w1 (VMEM-resident)
            pl.BlockSpec((10, 1), lambda i: (0, 0)),        # b1 (resident)
            pl.BlockSpec((10, 1), lambda i: (0, 0)),        # w2 column (resident)
            pl.BlockSpec((1, 1), lambda i: (0, 0)),         # b2 (resident)
        ],
        out_specs=pl.BlockSpec((1, tile_b), lambda i: (0, i)),
        compiler_params=pltpu.CompilerParams(
            dimension_semantics=("parallel",),              # megacore on v7x
            vmem_limit_bytes=vmem_limit,
        ),
        cost_estimate=pl.CostEstimate(
            flops=230 * B,                                  # ~2*10*10 + layer-2
            transcendentals=11 * B,                         # 10 + 1 sigmoids/elem
            bytes_accessed=44 * B + 480,                    # 40 in + 4 out + weights
        ),
    )(x, w1, b1_col, w2_col, b2_col)

    # (1, B) and (B, 1) share the same row-major flat layout -> free reshape.
    return out.reshape(B, 1)


def init_params(key):
    """Deterministic init mirroring nn.Linear's U(-1/sqrt(fan_in), 1/sqrt(fan_in)).

    Weights are kept in PyTorch (out, in) layout.
    """
    k1, k2, k3, k4 = jax.random.split(key, 4)
    lim = 1.0 / jnp.sqrt(10.0)
    w1 = jax.random.uniform(k1, (10, 10), jnp.float32, -lim, lim)   # (out, in)
    b1 = jax.random.uniform(k2, (10,), jnp.float32, -lim, lim)
    w2 = jax.random.uniform(k3, (1, 10), jnp.float32, -lim, lim)    # (out, in)
    b2 = jax.random.uniform(k4, (1,), jnp.float32, -lim, lim)
    return w1, b1, w2, b2


def _reference(x, w1, b1, w2, b2):
    h = jax.nn.sigmoid(x @ w1.T + b1)
    return jax.nn.sigmoid(h @ w2.T + b2)


if __name__ == "__main__":
    key = jax.random.PRNGKey(0)
    k_params, k_x1, k_x2 = jax.random.split(key, 3)
    w1, b1, w2, b2 = init_params(k_params)

    # Small example batch (matches the module spec: features = 10).
    B = 8
    x = jax.random.normal(k_x1, (B, 10), jnp.float32)
    out = jax.block_until_ready(simple_fc_forward(x, w1, b1, w2, b2))
    ref = _reference(x, w1, b1, w2, b2)
    assert out.shape == (B, 1)
    assert jnp.allclose(out, ref, atol=1e-5, rtol=1e-5)

    # Exercise the multi-step grid and the partial (out-of-bounds) last tile.
    B2 = 300
    x2 = jax.random.normal(k_x2, (B2, 10), jnp.float32)
    out2 = jax.block_until_ready(simple_fc_forward(x2, w1, b1, w2, b2))
    ref2 = _reference(x2, w1, b1, w2, b2)
    assert out2.shape == (B2, 1)
    assert jnp.allclose(out2, ref2, atol=1e-5, rtol=1e-5)

    print("KERNEL_OK")
</pallas_src>

<mosaic_0001>
module attributes {stable_mosaic.version = 11 : i64} {
  func.func @_fc_kernel(%arg0: i32, %arg1: memref<128x10xf32, #tpu.memory_space<vmem>>, %arg2: memref<10x10xf32, #tpu.memory_space<vmem>>, %arg3: memref<10x1xf32, #tpu.memory_space<vmem>>, %arg4: memref<10x1xf32, #tpu.memory_space<vmem>>, %arg5: memref<1x1xf32, #tpu.memory_space<vmem>>, %arg6: memref<1x128xf32, #tpu.memory_space<vmem>>) attributes {dimension_semantics = [#tpu.dimension_semantics<parallel>], iteration_bounds = array<i64: 1>, scalar_prefetch = 0 : i64, scratch_operands = 0 : i64, tpu.core_type = #tpu.core_type<tc>, window_params = [{transform_indices = @transform_0, window_bounds = array<i64: 128, 10>}, {pipeline_mode = #tpu.pipeline_mode<synchronous>, transform_indices = @transform_1, window_bounds = array<i64: 10, 10>}, {pipeline_mode = #tpu.pipeline_mode<synchronous>, transform_indices = @transform_2, window_bounds = array<i64: 10, 1>}, {pipeline_mode = #tpu.pipeline_mode<synchronous>, transform_indices = @transform_3, window_bounds = array<i64: 10, 1>}, {pipeline_mode = #tpu.pipeline_mode<synchronous>, transform_indices = @transform_4, window_bounds = array<i64: 1, 1>}, {transform_indices = @transform_5, window_bounds = array<i64: 1, 128>}]} {
    %c0 = arith.constant 0 : index
    %c0_0 = arith.constant 0 : index
    %0 = vector.load %arg1[%c0, %c0_0] : memref<128x10xf32, #tpu.memory_space<vmem>>, vector<128x10xf32>
    %c0_1 = arith.constant 0 : index
    %c0_2 = arith.constant 0 : index
    %1 = vector.load %arg2[%c0_1, %c0_2] : memref<10x10xf32, #tpu.memory_space<vmem>>, vector<10x10xf32>
    %cst = arith.constant dense<0.000000e+00> : vector<10x128xf32>
    %2 = tpu.matmul %1, %0, %cst {dimension_numbers = #tpu.dot_dimension_numbers<[1], [1], [0], [0], [0, 0, 1, 0], [], []>} : vector<10x10xf32>, vector<128x10xf32>, vector<10x128xf32> -> vector<10x128xf32>
    %c0_3 = arith.constant 0 : index
    %c0_4 = arith.constant 0 : index
    %3 = vector.load %arg3[%c0_3, %c0_4] : memref<10x1xf32, #tpu.memory_space<vmem>>, vector<10x1xf32>
    %4 = vector.broadcast %3 : vector<10x1xf32> to vector<10x128xf32>
    %5 = arith.addf %2, %4 : vector<10x128xf32>
    %cst_5 = arith.constant 5.000000e-01 : f32
    %6 = vector.broadcast %cst_5 : f32 to vector<10x128xf32>
    %7 = arith.mulf %6, %5 : vector<10x128xf32>
    %8 = math.tanh %7 : vector<10x128xf32>
    %cst_6 = arith.constant 5.000000e-01 : f32
    %9 = vector.broadcast %cst_6 : f32 to vector<10x128xf32>
    %10 = arith.mulf %9, %8 : vector<10x128xf32>
    %cst_7 = arith.constant 5.000000e-01 : f32
    %11 = vector.broadcast %cst_7 : f32 to vector<10x128xf32>
    %12 = arith.addf %10, %11 : vector<10x128xf32>
    %c0_8 = arith.constant 0 : index
    %c0_9 = arith.constant 0 : index
    %13 = vector.load %arg4[%c0_8, %c0_9] : memref<10x1xf32, #tpu.memory_space<vmem>>, vector<10x1xf32>
    %14 = vector.broadcast %13 : vector<10x1xf32> to vector<10x128xf32>
    %15 = arith.mulf %14, %12 : vector<10x128xf32>
    %cst_10 = arith.constant dense<0.000000e+00> : vector<128xf32>
    %16 = vector.multi_reduction <add>, %15, %cst_10 [0] : vector<10x128xf32> to vector<128xf32>
    %17 = vector.shape_cast %16 : vector<128xf32> to vector<1x128xf32>
    %c0_11 = arith.constant 0 : index
    %c0_12 = arith.constant 0 : index
    %18 = vector.load %arg5[%c0_11, %c0_12] : memref<1x1xf32, #tpu.memory_space<vmem>>, vector<1x1xf32>
    %19 = vector.broadcast %18 : vector<1x1xf32> to vector<1x128xf32>
    %20 = arith.addf %17, %19 : vector<1x128xf32>
    %cst_13 = arith.constant 5.000000e-01 : f32
    %21 = vector.broadcast %cst_13 : f32 to vector<1x128xf32>
    %22 = arith.mulf %21, %20 : vector<1x128xf32>
    %23 = math.tanh %22 : vector<1x128xf32>
    %cst_14 = arith.constant 5.000000e-01 : f32
    %24 = vector.broadcast %cst_14 : f32 to vector<1x128xf32>
    %25 = arith.mulf %24, %23 : vector<1x128xf32>
    %cst_15 = arith.constant 5.000000e-01 : f32
    %26 = vector.broadcast %cst_15 : f32 to vector<1x128xf32>
    %27 = arith.addf %25, %26 : vector<1x128xf32>
    %c0_16 = arith.constant 0 : index
    %c0_17 = arith.constant 0 : index
    %28 = vector.load %arg6[%c0_16, %c0_17] : memref<1x128xf32, #tpu.memory_space<vmem>>, vector<1x128xf32>
    tpu.vector_store %arg6[%c0_16, %c0_17], %27 {strides = array<i32>} : memref<1x128xf32, #tpu.memory_space<vmem>>, vector<1x128xf32>,
    return
  }
  func.func @transform_0(%arg0: i32) -> (i32, i32) {
    %c0_i32 = arith.constant 0 : i32
    %c0_i32_0 = arith.constant 0 : i32
    return %arg0, %c0_i32 : i32, i32
  }
  func.func @transform_1(%arg0: i32) -> (i32, i32) {
    %c0_i32 = arith.constant 0 : i32
    %c0_i32_0 = arith.constant 0 : i32
    %c0_i32_1 = arith.constant 0 : i32
    return %c0_i32, %c0_i32_0 : i32, i32
  }
  func.func @transform_2(%arg0: i32) -> (i32, i32) {
    %c0_i32 = arith.constant 0 : i32
    %c0_i32_0 = arith.constant 0 : i32
    %c0_i32_1 = arith.constant 0 : i32
    return %c0_i32, %c0_i32_0 : i32, i32
  }
  func.func @transform_3(%arg0: i32) -> (i32, i32) {
    %c0_i32 = arith.constant 0 : i32
    %c0_i32_0 = arith.constant 0 : i32
    %c0_i32_1 = arith.constant 0 : i32
    return %c0_i32, %c0_i32_0 : i32, i32
  }
  func.func @transform_4(%arg0: i32) -> (i32, i32) {
    %c0_i32 = arith.constant 0 : i32
    %c0_i32_0 = arith.constant 0 : i32
    %c0_i32_1 = arith.constant 0 : i32
    return %c0_i32, %c0_i32_0 : i32, i32
  }
  func.func @transform_5(%arg0: i32) -> (i32, i32) {
    %c0_i32 = arith.constant 0 : i32
    %c0_i32_0 = arith.constant 0 : i32
    return %c0_i32, %arg0 : i32, i32
  }
}

</mosaic_0001>

<bundles_post_ra>
// kernel: tpu_custom_call.1
= control target key start
LH: loop header
LB: loop body
LE: loop exit
PB: predicated region body
PF: predicated region fallthrough
CT: control target
= control target key end

     0   :  { %s550_s0 = inlined_call_operand.vmem [shape: f32[8,10], index: 0, kind: input, shape index: {}]   ;;  %s551_s1 = inlined_call_operand.vmem [shape: f32[10,10], index: 1, kind: input, shape index: {}]   ;;  %s552_s2 = inlined_call_operand.vmem [shape: f32[10,1], index: 2, kind: input, shape index: {}]   ;;  %s553_s3 = inlined_call_operand.vmem [shape: f32[10,1], index: 3, kind: input, shape index: {}]   ;;  %s554_s4 = inlined_call_operand.<no memory space> [shape: f32[1,1], index: 4, kind: input, shape index: {}]   ;;  %s555_s5 = inlined_call_operand.hbm [shape: f32[1,8], index: 5, kind: output, shape index: {}]  }
   0x1   :  { %v10_v0 = vstv %s554_s4 }
   0x2   :  { %11 = vst [vmem:[#allocation2] sm:$0x1] %v10_v0 }
   0x3   :  { %v23_v1 = vld [vmem:[%s550_s0] sm:$0xff]  ;;  %v24_v2 = vld [vmem:[%s550_s0 + $0x8] sm:$0xff]  ;;  %vm53_vm0 = vcmask 80896   ;;  %v25_v3 = vld [vmem:[%s550_s0 + $0x10] sm:$0xff]  ;;  %v397_v7 = vmov 0  }
   0x4   :  { %v315_v4 = vpack.c.bf16 %v24_v2, %v23_v1  ;;  %vm443_vm1 = vmpackc.low %vm53_vm0, %vm53_vm0  ;;  %v26_v6 = vld [vmem:[%s550_s0 + $0x18] sm:$0xff]  ;;  %365 = vset.pattern.permute.xlu0 %v397_v7  ;;  %366 = vset.pattern.permute.xlu1 %v397_v7  ;;  %v39_v9 = vld [vmem:[%s551_s1] sm:$0xff] }
   0x5   :  { %v321_v8 = vpack.c.bf16 %v26_v6, %v25_v3  ;;  %v27_v10 = vld [vmem:[%s550_s0 + $0x20] sm:$0xff]  ;;  %v28_v11 = vld [vmem:[%s550_s0 + $0x28] sm:$0xff]  ;;  %312 = vmatprep.mubr.msk.f32.mxu0 %vm53_vm0, %v39_v9 }
   0x6   :  { %317 = vmatprep.subr.msk.bf16.mxu0 %vm443_vm1, %v315_v4  ;;  %v42_v12 = vld [vmem:[%s552_s2 + $0x8] sm:$0x3]  ;;  %v41_v14 = vld [vmem:[%s552_s2] sm:$0xff] }
   0x7   :  { %320 = vmatpush3.bf16.xpose.msk.msra.mxu0 %vm443_vm1, %v315_v4  ;;  %50 = vperm.xlu0 %365, %v42_v12   ;;  %v192_v13 = vld [vmem:[%s553_s3 + $0x8] sm:$0x3] }
   0x8   :  { %323 = vmatprep.subr.msk.bf16.mxu0 %vm443_vm1, %v321_v8  ;;  %200 = vperm.xlu1 %366, %v192_v13  }
   0x9   :  { %12 = vsyncpa [#allocation4], 0  ;;  %v327_v15 = vpack.c.bf16 %v28_v11, %v27_v10  ;;  %v191_v16 = vld [vmem:[%s553_s3] sm:$0xff]  ;;  %v29_v18 = vld [vmem:[%s550_s0 + $0x30] sm:$0xff]  ;;  %vm205_vm2 = vcmask 1041408   ;;  %v220_v53 = vlaneseq }
   0xa   :  { %v214_v17 = vld [vmem:[#allocation2] sm:$0x1]  ;;  %v30_v19 = vld [vmem:[%s550_s0 + $0x38] sm:$0xff]  ;;  %v32_v22 = vld [vmem:[%s550_s0 + $0x48] sm:$0xff] }
   0xb   :  { %45 = vperm.xlu0 %365, %v41_v14   ;;  %v333_v20 = vpack.c.bf16 %v30_v19, %v29_v18  ;;  %v31_v21 = vld [vmem:[%s550_s0 + $0x40] sm:$0xff]  ;;  %v33_v24 = vld [vmem:[%s550_s0 + $0x50] sm:$0xff]  ;;  %v34_v25 = vld [vmem:[%s550_s0 + $0x58] sm:$0xff]  ;;  %v221_v56 = vshrl.u32 %v220_v53, 7 }
   0xc   :  { %195 = vperm.xlu1 %366, %v191_v16   ;;  %v339_v23 = vpack.c.bf16 %v32_v22, %v31_v21  ;;  %v345_v26 = vpack.c.bf16 %v34_v25, %v33_v24  ;;  %v35_v27 = vld [vmem:[%s550_s0 + $0x60] sm:$0xff]  ;;  %v36_v28 = vld [vmem:[%s550_s0 + $0x68] sm:$0xff]  ;;  %v37_v30 = vld [vmem:[%s550_s0 + $0x70] sm:$0xff] }
   0xd   :  { %v351_v29 = vpack.c.bf16 %v36_v28, %v35_v27  ;;  %v38_v31 = vld [vmem:[%s550_s0 + $0x78] sm:$0xff]  ;;  %v40_v33 = vld [vmem:[%s551_s1 + $0x8] sm:$0x3]  ;;  %v222_v59 = vsub.s32 0, %v221_v56  ;;  %s398_s0 = smov [#allocation3]  }
   0xe   :  { %v357_v32 = vpack.c.bf16 %v38_v31, %v37_v30  ;;  %s236_s1 = sshll.u32 %s398_s0, 4  ;;  %s237_s1 = int_to_ptr.vmem [resolvable:$true] %s236_s1 }
   0xf   :  { %326 = vmatpush3.bf16.xpose.msk.msra.mxu0 %vm443_vm1, %v321_v8  ;;  %217 = vperm.xlu0 %365, %v214_v17   ;;  %s373_s10 = scalar_lea.vmem %s237_s1, 16  ;;  %s377_s11 = scalar_lea.vmem %s237_s1, 32 }
  0x10   :  { %329 = vmatprep.subr.msk.bf16.mxu0 %vm443_vm1, %v327_v15  ;;  %p374_p0 = scmp.ne.s32.totalorder %s237_s1, %s373_s10  ;;  %p378_p1 = scmp.lt.s32.totalorder %s237_s1, %s237_s1 }
  0x11   :  { %p379_p2 = scmp.lt.s32.totalorder %s377_s11, %s373_s10 }
  0x13   :  { %p380_p3 = por %p379_p2, %p378_p1 }
  0x15   :  { %p381_p4 = pnand %p380_p3, %p374_p0 }
  0x17   :  { %332 = vmatpush3.bf16.xpose.msk.msra.mxu0 %vm443_vm1, %v327_v15 }
  0x18   :  { %335 = vmatprep.subr.msk.bf16.mxu0 %vm443_vm1, %v333_v20 }
  0x1f   :  { %338 = vmatpush3.bf16.xpose.msk.msra.mxu0 %vm443_vm1, %v333_v20 }
  0x20   :  { %341 = vmatprep.subr.msk.bf16.mxu0 %vm443_vm1, %v339_v23 }
  0x27   :  { %344 = vmatpush3.bf16.xpose.msk.msra.mxu0 %vm443_vm1, %v339_v23 }
  0x28   :  { %347 = vmatprep.subr.msk.bf16.mxu0 %vm443_vm1, %v345_v26 }
  0x2f   :  { %350 = vmatpush3.bf16.xpose.msk.msra.mxu0 %vm443_vm1, %v345_v26 }
  0x30   :  { %353 = vmatprep.subr.msk.bf16.mxu0 %vm443_vm1, %v351_v29 }
  0x37   :  { %356 = vmatpush3.bf16.xpose.msk.msra.mxu0 %vm443_vm1, %v351_v29 }
  0x38   :  { %359 = vmatprep.subr.msk.bf16.mxu0 %vm443_vm1, %v357_v32 }
  0x3f   :  { %362 = vmatpush3.bf16.xpose.msk.msra.mxu0 %vm443_vm1, %v357_v32 }
  0x46   :  { %313 = vmatmul.mubr.msk.f32.vlgmr.msra.gmra.mrb[0].mxu0 %vm53_vm0, %v40_v33 }
  0x86   :  { %v51_v34 = vpop.permute.xlu0 %50 }
  0x87   :  { %v201_v42 = vpop.permute.xlu1 %200 }
  0x8a   :  { %v46_v36 = vpop.permute.xlu0 %45 }
  0x8b   :  { %v196_v50 = vpop.permute.xlu1 %195 }
  0x8e   :  { %v218_v61 = vpop.permute.xlu0 %217 }
  0x8f   :  { %v223_v63 = vrot.slane %v218_v61, %v222_v59 }
 0x119   :  { %v314_v35 = vpop.f32.mrb[0].mxu0 }
 0x11a   :  { %v180_v37 = vadd.f32 %v314_v35, %v51_v34  ;;  %v174_v38 = vpop.f32.mrb[1].mxu0 }
 0x11b   :  { %v175_v39 = vadd.f32 %v174_v38, %v46_v36 }
 0x11c   :  { %v184_v40 = vmul.f32 0.5, %v180_v37 }
 0x11d   :  { %v183_v41 = vmul.f32 0.5, %v175_v39 }
 0x11e   :  { %367 = vtanh.f32 %v184_v40 }
 0x11f   :  { %369 = vtanh.f32 %v183_v41 }
 0x128   :  { %v368_v43 = vpop.eup %367 }
 0x129   :  { %v370_v44 = vpop.eup %369  ;;  %v188_v45 = vmul.f32 0.5, %v368_v43 }
 0x12a   :  { %v187_v46 = vmul.f32 0.5, %v370_v44 }
 0x12b   :  { %v190_v47 = vadd.f32 0.5, %v188_v45 }
 0x12c   :  { %v189_v48 = vadd.f32 0.5, %v187_v46 }
 0x12d   :  { %v204_v49 = vmul.f32 %v201_v42, %v190_v47 }
 0x12e   :  { %v203_v51 = vmul.f32 %v196_v50, %v189_v48 }
 0x12f   :  { %v206_v52 = vsel %vm205_vm2, %v204_v49, 0.0 }
 0x130   :  { %v207_v54 = vadd.f32 %v206_v52, %v203_v51 }
 0x132   :  { %v208_v55 = vrot.slane %v207_v54, 4 }
 0x134   :  { %v209_v57 = vadd.f32 %v208_v55, %v207_v54 }
 0x136   :  { %v210_v58 = vrot.slane %v209_v57, 2 }
 0x138   :  { %v211_v60 = vadd.f32 %v210_v58, %v209_v57 }
 0x13a   :  { %v212_v62 = vrot.slane %v211_v60, 1 }
 0x13c   :  { %v213_v0 = vadd.f32 %v212_v62, %v211_v60 }
 0x13e   :  { %v224_v1 = vadd.f32 %v223_v63, %v213_v0 }
 0x140   :  { %v225_v2 = vmul.f32 0.5, %v224_v1 }
 0x142   :  { %371 = vtanh.f32 %v225_v2 }
 0x14c   :  { %v372_v3 = vpop.eup %371 }
 0x14d   :  { %v227_v4 = vmul.f32 0.5, %v372_v3 }
 0x14f   :  { %v228_v5 = vadd.f32 0.5, %v227_v4 }
 0x151   :  { %229 = vst [vmem:[#allocation3] sm:$0x1] %v228_v5 }
 0x152   :  { %384 = shalt.err (!%p381_p4)
}
 0x153   :  { %s385_s14 = scalar_lea.hbm %s555_s5, 16 }
 0x154   :  { %p386_p5 = scmp.ne.s32.totalorder %s555_s5, %s385_s14  ;;  %p389_p6 = scmp.lt.u32.totalorder %s385_s14, %s555_s5 }
 0x156   :  { %p391_p7 = pnand %p389_p6, %p386_p5 }
 0x158   :  { %394 = shalt.err (!%p391_p7)
}
 0x159   :  { %239 = dma.vmem_to_hbm [thread:$0]  %s237_s1, 16, %s555_s5, [#allocation4]  }
 0x15a   :  { %395 = dma.done.wait [#allocation4], 16  }
 0x15b   :  { %396 = vsyncadd [#allocation4], 4294967280 }
 0x15c   :  { %243 = vsyncpa [#allocation4], 1 }

</bundles_post_ra>
